<compile_context>
chip_gen: v6e
topology: v6e:2x2x1
jax: 0.10.0
libtpu: 0.0.40
codegen_flags: <defaults>
</compile_context>

<pallas_src>
import jax
import jax.numpy as jnp
from jax.experimental import pallas as pl
from jax.experimental.pallas import tpu as pltpu


_EPS = 1e-12        # F.normalize default eps
_LANE = 128         # lane width / tail-layer padding target
_HIDDEN = (384, 256, 128, 64, 8)


def _l2_normalize(x):
    # x / max(||x||, eps)  ==  x * rsqrt(max(||x||^2, eps^2))   (sqrt is monotone)
    ss = jnp.sum(x * x, axis=-1, keepdims=True)
    inv = jax.lax.rsqrt(jnp.maximum(ss, _EPS * _EPS))
    return x * inv


def fullynet_kernel(x_ref,
                    w1_ref, b1_ref, w2_ref, b2_ref, w3_ref, b3_ref,
                    w4_ref, b4_ref, w5_ref, b5_ref, w6_ref, b6_ref,
                    o_ref):
    def layer(h, w_ref, b_ref):
        h = _l2_normalize(h)                       # f32 (VPU + EUP rsqrt)
        h = h.astype(w_ref.dtype)                  # bf16 operand for the MXU
        return jnp.dot(h, w_ref[...],
                       preferred_element_type=jnp.float32) + b_ref[...]

    h = x_ref[...].astype(jnp.float32)
    h = layer(h, w1_ref, b1_ref)   # (TILE_B, 384)
    h = layer(h, w2_ref, b2_ref)   # (TILE_B, 256)
    h = layer(h, w3_ref, b3_ref)   # (TILE_B, 128)
    h = layer(h, w4_ref, b4_ref)   # (TILE_B, 64)
    h = layer(h, w5_ref, b5_ref)   # (TILE_B, 128)  -- 8 real cols, zero-padded
    h = layer(h, w6_ref, b6_ref)   # (TILE_B, 128)  -- out_dim real cols, zero-padded
    o_ref[...] = h.astype(o_ref.dtype)


def init_params(key, input_dim, out_dim=1, dtype=jnp.float32):
    """Deterministic params. Weights stored as (in, out); biases as (1, out)."""
    dims = [input_dim, *_HIDDEN, out_dim]
    params = []
    for i in range(6):
        fan_in, fan_out = dims[i], dims[i + 1]
        key, kw, kb = jax.random.split(key, 3)
        bound = 1.0 / jnp.sqrt(fan_in)  # torch.nn.Linear default init range
        w = jax.random.uniform(kw, (fan_in, fan_out), dtype, -bound, bound)
        b = jax.random.uniform(kb, (1, fan_out), dtype, -bound, bound)
        params.append((w, b))
    return params


def _prepare_params(params, compute_dtype=jnp.bfloat16):
    """Pad tail layers to 128 lanes (zeros -> identical math) and cast weights."""
    (w1, b1), (w2, b2), (w3, b3), (w4, b4), (w5, b5), (w6, b6) = params

    def pad_cols(a):
        return jnp.pad(a, ((0, 0), (0, _LANE - a.shape[1])))

    w5p, b5p = pad_cols(w5), pad_cols(b5)
    w6p = jnp.pad(w6, ((0, _LANE - w6.shape[0]), (0, _LANE - w6.shape[1])))
    b6p = pad_cols(b6)

    flat = []
    for w, b in [(w1, b1), (w2, b2), (w3, b3), (w4, b4), (w5p, b5p), (w6p, b6p)]:
        flat.append(w.astype(compute_dtype))   # bf16 MXU operand, VMEM-resident
        flat.append(b.astype(jnp.float32))     # f32 bias added to f32 accumulator
    return flat


def fullynet_forward(x, params, compute_dtype=jnp.bfloat16):
    B, d_in = x.shape
    out_dim = params[-1][0].shape[1]
    out_dtype = x.dtype

    flat = _prepare_params(params, compute_dtype)

    # 512 rows/step (multiple of 256 and 128 -> feeds every MXU generation);
    # small batches just round up to the 8-row sublane granule.
    tile_b = 512 if B >= 512 else -(-B // 8) * 8
    b_pad = -(-B // tile_b) * tile_b
    if b_pad != B:
        x = jnp.pad(x, ((0, b_pad - B), (0, 0)))   # zero rows: normalize -> 0, sliced off

    in_specs = [pl.BlockSpec((tile_b, d_in), lambda i: (i, 0))]
    for a in flat:
        # constant block index -> weights/biases stay resident in VMEM across steps
        in_specs.append(pl.BlockSpec(a.shape, lambda i: (0, 0)))
    out_spec = pl.BlockSpec((tile_b, _LANE), lambda i: (i, 0))

    layer_dims = [d_in, 384, 256, 128, 64, _LANE, _LANE]
    mm_flops = 2 * b_pad * sum(layer_dims[i] * layer_dims[i + 1] for i in range(6))
    bytes_accessed = (int(x.size) * x.dtype.itemsize
                      + b_pad * _LANE * 4
                      + sum(int(a.size) * a.dtype.itemsize for a in flat))
    cost = pl.CostEstimate(flops=int(mm_flops),
                           transcendentals=int(6 * b_pad),
                           bytes_accessed=int(bytes_accessed))

    out_padded = pl.pallas_call(
        fullynet_kernel,
        out_shape=jax.ShapeDtypeStruct((b_pad, _LANE), jnp.float32),
        grid=(b_pad // tile_b,),
        in_specs=in_specs,
        out_specs=out_spec,
        compiler_params=pltpu.CompilerParams(dimension_semantics=("parallel",)),
        cost_estimate=cost,
    )(x, *flat)

    return out_padded[:B, :out_dim].astype(out_dtype)


def fullynet_reference(x, params):
    """Pure-f32 reference (matches the PyTorch module)."""
    h = x.astype(jnp.float32)
    for w, b in params:
        h = _l2_normalize(h) @ w + b
    return h


def fullynet_reference_bf16(x, params):
    """Reference mirroring the kernel math: f32 norm, bf16 operands, f32 accumulation."""
    h = x.astype(jnp.float32)
    for w, b in params:
        hn = _l2_normalize(h)
        h = jnp.dot(hn.astype(jnp.bfloat16), w.astype(jnp.bfloat16),
                    preferred_element_type=jnp.float32) + b.astype(jnp.float32)
    return h


if __name__ == "__main__":
    key = jax.random.PRNGKey(0)
    k_x, k_p = jax.random.split(key)

    batch, input_dim, out_dim = 8, 32, 1
    x = jax.random.normal(k_x, (batch, input_dim), jnp.float32)
    params = init_params(k_p, input_dim, out_dim)

    out = jax.block_until_ready(fullynet_forward(x, params))
    assert out.shape == (batch, out_dim)

    ref_match = fullynet_reference_bf16(x, params)   # same precision recipe as kernel
    ref_f32 = fullynet_reference(x, params)          # full-f32 PyTorch-equivalent math
    assert jnp.allclose(out, ref_match, atol=1e-4, rtol=1e-4), \
        float(jnp.max(jnp.abs(out - ref_match)))
    assert jnp.allclose(out, ref_f32, atol=5e-2, rtol=5e-2), \
        float(jnp.max(jnp.abs(out - ref_f32)))

    print("KERNEL_OK")
</pallas_src>

<mosaic_0001>
module attributes {stable_mosaic.version = 11 : i64} {
  func.func @fullynet_kernel(%arg0: i32, %arg1: memref<8x32xf32, #tpu.memory_space<vmem>>, %arg2: memref<32x384xbf16, #tpu.memory_space<vmem>>, %arg3: memref<1x384xf32, #tpu.memory_space<vmem>>, %arg4: memref<384x256xbf16, #tpu.memory_space<vmem>>, %arg5: memref<1x256xf32, #tpu.memory_space<vmem>>, %arg6: memref<256x128xbf16, #tpu.memory_space<vmem>>, %arg7: memref<1x128xf32, #tpu.memory_space<vmem>>, %arg8: memref<128x64xbf16, #tpu.memory_space<vmem>>, %arg9: memref<1x64xf32, #tpu.memory_space<vmem>>, %arg10: memref<64x128xbf16, #tpu.memory_space<vmem>>, %arg11: memref<1x128xf32, #tpu.memory_space<vmem>>, %arg12: memref<128x128xbf16, #tpu.memory_space<vmem>>, %arg13: memref<1x128xf32, #tpu.memory_space<vmem>>, %arg14: memref<8x128xf32, #tpu.memory_space<vmem>>) attributes {dimension_semantics = [#tpu.dimension_semantics<parallel>], iteration_bounds = array<i64: 1>, scalar_prefetch = 0 : i64, scratch_operands = 0 : i64, tpu.core_type = #tpu.core_type<tc>, window_params = [{transform_indices = @transform_0, window_bounds = array<i64: 8, 32>}, {pipeline_mode = #tpu.pipeline_mode<synchronous>, transform_indices = @transform_1, window_bounds = array<i64: 32, 384>}, {pipeline_mode = #tpu.pipeline_mode<synchronous>, transform_indices = @transform_2, window_bounds = array<i64: 1, 384>}, {pipeline_mode = #tpu.pipeline_mode<synchronous>, transform_indices = @transform_3, window_bounds = array<i64: 384, 256>}, {pipeline_mode = #tpu.pipeline_mode<synchronous>, transform_indices = @transform_4, window_bounds = array<i64: 1, 256>}, {pipeline_mode = #tpu.pipeline_mode<synchronous>, transform_indices = @transform_5, window_bounds = array<i64: 256, 128>}, {pipeline_mode = #tpu.pipeline_mode<synchronous>, transform_indices = @transform_6, window_bounds = array<i64: 1, 128>}, {pipeline_mode = #tpu.pipeline_mode<synchronous>, transform_indices = @transform_7, window_bounds = array<i64: 128, 64>}, {pipeline_mode = #tpu.pipeline_mode<synchronous>, transform_indices = @transform_8, window_bounds = array<i64: 1, 64>}, {pipeline_mode = #tpu.pipeline_mode<synchronous>, transform_indices = @transform_9, window_bounds = array<i64: 64, 128>}, {pipeline_mode = #tpu.pipeline_mode<synchronous>, transform_indices = @transform_10, window_bounds = array<i64: 1, 128>}, {pipeline_mode = #tpu.pipeline_mode<synchronous>, transform_indices = @transform_11, window_bounds = array<i64: 128, 128>}, {pipeline_mode = #tpu.pipeline_mode<synchronous>, transform_indices = @transform_12, window_bounds = array<i64: 1, 128>}, {transform_indices = @transform_13, window_bounds = array<i64: 8, 128>}]} {
    %c0 = arith.constant 0 : index
    %c0_0 = arith.constant 0 : index
    %0 = vector.load %arg1[%c0, %c0_0] : memref<8x32xf32, #tpu.memory_space<vmem>>, vector<8x32xf32>
    %1 = arith.mulf %0, %0 : vector<8x32xf32>
    %cst = arith.constant dense<0.000000e+00> : vector<8xf32>
    %2 = vector.multi_reduction <add>, %1, %cst [1] : vector<8x32xf32> to vector<8xf32>
    %3 = vector.shape_cast %2 : vector<8xf32> to vector<8x1xf32>
    %cst_1 = arith.constant 1.000000e-24 : f32
    %4 = vector.broadcast %cst_1 : f32 to vector<8x1xf32>
    %5 = arith.maximumf %3, %4 : vector<8x1xf32>
    %6 = math.rsqrt %5 : vector<8x1xf32>
    %7 = vector.broadcast %6 : vector<8x1xf32> to vector<8x32xf32>
    %8 = arith.mulf %0, %7 : vector<8x32xf32>
    %9 = arith.truncf %8 : vector<8x32xf32> to vector<8x32xbf16>
    %c0_2 = arith.constant 0 : index
    %c0_3 = arith.constant 0 : index
    %10 = vector.load %arg2[%c0_2, %c0_3] : memref<32x384xbf16, #tpu.memory_space<vmem>>, vector<32x384xbf16>
    %cst_4 = arith.constant dense<0.000000e+00> : vector<8x384xf32>
    %11 = tpu.matmul %9, %10, %cst_4 {dimension_numbers = #tpu.dot_dimension_numbers<[1], [0], [0], [1], [0, 0, 1, 1], [], []>} : vector<8x32xbf16>, vector<32x384xbf16>, vector<8x384xf32> -> vector<8x384xf32>
    %c0_5 = arith.constant 0 : index
    %c0_6 = arith.constant 0 : index
    %12 = vector.load %arg3[%c0_5, %c0_6] : memref<1x384xf32, #tpu.memory_space<vmem>>, vector<1x384xf32>
    %13 = vector.broadcast %12 : vector<1x384xf32> to vector<8x384xf32>
    %14 = arith.addf %11, %13 : vector<8x384xf32>
    %15 = arith.mulf %14, %14 : vector<8x384xf32>
    %cst_7 = arith.constant dense<0.000000e+00> : vector<8xf32>
    %16 = vector.multi_reduction <add>, %15, %cst_7 [1] : vector<8x384xf32> to vector<8xf32>
    %17 = vector.shape_cast %16 : vector<8xf32> to vector<8x1xf32>
    %cst_8 = arith.constant 1.000000e-24 : f32
    %18 = vector.broadcast %cst_8 : f32 to vector<8x1xf32>
    %19 = arith.maximumf %17, %18 : vector<8x1xf32>
    %20 = math.rsqrt %19 : vector<8x1xf32>
    %21 = vector.broadcast %20 : vector<8x1xf32> to vector<8x384xf32>
    %22 = arith.mulf %14, %21 : vector<8x384xf32>
    %23 = arith.truncf %22 : vector<8x384xf32> to vector<8x384xbf16>
    %c0_9 = arith.constant 0 : index
    %c0_10 = arith.constant 0 : index
    %24 = vector.load %arg4[%c0_9, %c0_10] : memref<384x256xbf16, #tpu.memory_space<vmem>>, vector<384x256xbf16>
    %cst_11 = arith.constant dense<0.000000e+00> : vector<8x256xf32>
    %25 = tpu.matmul %23, %24, %cst_11 {dimension_numbers = #tpu.dot_dimension_numbers<[1], [0], [0], [1], [0, 0, 1, 1], [], []>} : vector<8x384xbf16>, vector<384x256xbf16>, vector<8x256xf32> -> vector<8x256xf32>
    %c0_12 = arith.constant 0 : index
    %c0_13 = arith.constant 0 : index
    %26 = vector.load %arg5[%c0_12, %c0_13] : memref<1x256xf32, #tpu.memory_space<vmem>>, vector<1x256xf32>
    %27 = vector.broadcast %26 : vector<1x256xf32> to vector<8x256xf32>
    %28 = arith.addf %25, %27 : vector<8x256xf32>
    %29 = arith.mulf %28, %28 : vector<8x256xf32>
    %cst_14 = arith.constant dense<0.000000e+00> : vector<8xf32>
    %30 = vector.multi_reduction <add>, %29, %cst_14 [1] : vector<8x256xf32> to vector<8xf32>
    %31 = vector.shape_cast %30 : vector<8xf32> to vector<8x1xf32>
    %cst_15 = arith.constant 1.000000e-24 : f32
    %32 = vector.broadcast %cst_15 : f32 to vector<8x1xf32>
    %33 = arith.maximumf %31, %32 : vector<8x1xf32>
    %34 = math.rsqrt %33 : vector<8x1xf32>
    %35 = vector.broadcast %34 : vector<8x1xf32> to vector<8x256xf32>
    %36 = arith.mulf %28, %35 : vector<8x256xf32>
    %37 = arith.truncf %36 : vector<8x256xf32> to vector<8x256xbf16>
    %c0_16 = arith.constant 0 : index
    %c0_17 = arith.constant 0 : index
    %38 = vector.load %arg6[%c0_16, %c0_17] : memref<256x128xbf16, #tpu.memory_space<vmem>>, vector<256x128xbf16>
    %cst_18 = arith.constant dense<0.000000e+00> : vector<8x128xf32>
    %39 = tpu.matmul %37, %38, %cst_18 {dimension_numbers = #tpu.dot_dimension_numbers<[1], [0], [0], [1], [0, 0, 1, 1], [], []>} : vector<8x256xbf16>, vector<256x128xbf16>, vector<8x128xf32> -> vector<8x128xf32>
    %c0_19 = arith.constant 0 : index
    %c0_20 = arith.constant 0 : index
    %40 = vector.load %arg7[%c0_19, %c0_20] : memref<1x128xf32, #tpu.memory_space<vmem>>, vector<1x128xf32>
    %41 = vector.broadcast %40 : vector<1x128xf32> to vector<8x128xf32>
    %42 = arith.addf %39, %41 : vector<8x128xf32>
    %43 = arith.mulf %42, %42 : vector<8x128xf32>
    %cst_21 = arith.constant dense<0.000000e+00> : vector<8xf32>
    %44 = vector.multi_reduction <add>, %43, %cst_21 [1] : vector<8x128xf32> to vector<8xf32>
    %45 = vector.shape_cast %44 : vector<8xf32> to vector<8x1xf32>
    %cst_22 = arith.constant 1.000000e-24 : f32
    %46 = vector.broadcast %cst_22 : f32 to vector<8x1xf32>
    %47 = arith.maximumf %45, %46 : vector<8x1xf32>
    %48 = math.rsqrt %47 : vector<8x1xf32>
    %49 = vector.broadcast %48 : vector<8x1xf32> to vector<8x128xf32>
    %50 = arith.mulf %42, %49 : vector<8x128xf32>
    %51 = arith.truncf %50 : vector<8x128xf32> to vector<8x128xbf16>
    %c0_23 = arith.constant 0 : index
    %c0_24 = arith.constant 0 : index
    %52 = vector.load %arg8[%c0_23, %c0_24] : memref<128x64xbf16, #tpu.memory_space<vmem>>, vector<128x64xbf16>
    %cst_25 = arith.constant dense<0.000000e+00> : vector<8x64xf32>
    %53 = tpu.matmul %51, %52, %cst_25 {dimension_numbers = #tpu.dot_dimension_numbers<[1], [0], [0], [1], [0, 0, 1, 1], [], []>} : vector<8x128xbf16>, vector<128x64xbf16>, vector<8x64xf32> -> vector<8x64xf32>
    %c0_26 = arith.constant 0 : index
    %c0_27 = arith.constant 0 : index
    %54 = vector.load %arg9[%c0_26, %c0_27] : memref<1x64xf32, #tpu.memory_space<vmem>>, vector<1x64xf32>
    %55 = vector.broadcast %54 : vector<1x64xf32> to vector<8x64xf32>
    %56 = arith.addf %53, %55 : vector<8x64xf32>
    %57 = arith.mulf %56, %56 : vector<8x64xf32>
    %cst_28 = arith.constant dense<0.000000e+00> : vector<8xf32>
    %58 = vector.multi_reduction <add>, %57, %cst_28 [1] : vector<8x64xf32> to vector<8xf32>
    %59 = vector.shape_cast %58 : vector<8xf32> to vector<8x1xf32>
    %cst_29 = arith.constant 1.000000e-24 : f32
    %60 = vector.broadcast %cst_29 : f32 to vector<8x1xf32>
    %61 = arith.maximumf %59, %60 : vector<8x1xf32>
    %62 = math.rsqrt %61 : vector<8x1xf32>
    %63 = vector.broadcast %62 : vector<8x1xf32> to vector<8x64xf32>
    %64 = arith.mulf %56, %63 : vector<8x64xf32>
    %65 = arith.truncf %64 : vector<8x64xf32> to vector<8x64xbf16>
    %c0_30 = arith.constant 0 : index
    %c0_31 = arith.constant 0 : index
    %66 = vector.load %arg10[%c0_30, %c0_31] : memref<64x128xbf16, #tpu.memory_space<vmem>>, vector<64x128xbf16>
    %cst_32 = arith.constant dense<0.000000e+00> : vector<8x128xf32>
    %67 = tpu.matmul %65, %66, %cst_32 {dimension_numbers = #tpu.dot_dimension_numbers<[1], [0], [0], [1], [0, 0, 1, 1], [], []>} : vector<8x64xbf16>, vector<64x128xbf16>, vector<8x128xf32> -> vector<8x128xf32>
    %c0_33 = arith.constant 0 : index
    %c0_34 = arith.constant 0 : index
    %68 = vector.load %arg11[%c0_33, %c0_34] : memref<1x128xf32, #tpu.memory_space<vmem>>, vector<1x128xf32>
    %69 = vector.broadcast %68 : vector<1x128xf32> to vector<8x128xf32>
    %70 = arith.addf %67, %69 : vector<8x128xf32>
    %71 = arith.mulf %70, %70 : vector<8x128xf32>
    %cst_35 = arith.constant dense<0.000000e+00> : vector<8xf32>
    %72 = vector.multi_reduction <add>, %71, %cst_35 [1] : vector<8x128xf32> to vector<8xf32>
    %73 = vector.shape_cast %72 : vector<8xf32> to vector<8x1xf32>
    %cst_36 = arith.constant 1.000000e-24 : f32
    %74 = vector.broadcast %cst_36 : f32 to vector<8x1xf32>
    %75 = arith.maximumf %73, %74 : vector<8x1xf32>
    %76 = math.rsqrt %75 : vector<8x1xf32>
    %77 = vector.broadcast %76 : vector<8x1xf32> to vector<8x128xf32>
    %78 = arith.mulf %70, %77 : vector<8x128xf32>
    %79 = arith.truncf %78 : vector<8x128xf32> to vector<8x128xbf16>
    %c0_37 = arith.constant 0 : index
    %c0_38 = arith.constant 0 : index
    %80 = vector.load %arg12[%c0_37, %c0_38] : memref<128x128xbf16, #tpu.memory_space<vmem>>, vector<128x128xbf16>
    %cst_39 = arith.constant dense<0.000000e+00> : vector<8x128xf32>
    %81 = tpu.matmul %79, %80, %cst_39 {dimension_numbers = #tpu.dot_dimension_numbers<[1], [0], [0], [1], [0, 0, 1, 1], [], []>} : vector<8x128xbf16>, vector<128x128xbf16>, vector<8x128xf32> -> vector<8x128xf32>
    %c0_40 = arith.constant 0 : index
    %c0_41 = arith.constant 0 : index
    %82 = vector.load %arg13[%c0_40, %c0_41] : memref<1x128xf32, #tpu.memory_space<vmem>>, vector<1x128xf32>
    %83 = vector.broadcast %82 : vector<1x128xf32> to vector<8x128xf32>
    %84 = arith.addf %81, %83 : vector<8x128xf32>
    %c0_42 = arith.constant 0 : index
    %c0_43 = arith.constant 0 : index
    %85 = vector.load %arg14[%c0_42, %c0_43] : memref<8x128xf32, #tpu.memory_space<vmem>>, vector<8x128xf32>
    tpu.vector_store %arg14[%c0_42, %c0_43], %84 {strides = array<i32>} : memref<8x128xf32, #tpu.memory_space<vmem>>, vector<8x128xf32>,
    return
  }
  func.func @transform_0(%arg0: i32) -> (i32, i32) {
    %c0_i32 = arith.constant 0 : i32
    %c0_i32_0 = arith.constant 0 : i32
    return %arg0, %c0_i32 : i32, i32
  }
  func.func @transform_1(%arg0: i32) -> (i32, i32) {
    %c0_i32 = arith.constant 0 : i32
    %c0_i32_0 = arith.constant 0 : i32
    %c0_i32_1 = arith.constant 0 : i32
    return %c0_i32, %c0_i32_0 : i32, i32
  }
  func.func @transform_2(%arg0: i32) -> (i32, i32) {
    %c0_i32 = arith.constant 0 : i32
    %c0_i32_0 = arith.constant 0 : i32
    %c0_i32_1 = arith.constant 0 : i32
    return %c0_i32, %c0_i32_0 : i32, i32
  }
  func.func @transform_3(%arg0: i32) -> (i32, i32) {
    %c0_i32 = arith.constant 0 : i32
    %c0_i32_0 = arith.constant 0 : i32
    %c0_i32_1 = arith.constant 0 : i32
    return %c0_i32, %c0_i32_0 : i32, i32
  }
  func.func @transform_4(%arg0: i32) -> (i32, i32) {
    %c0_i32 = arith.constant 0 : i32
    %c0_i32_0 = arith.constant 0 : i32
    %c0_i32_1 = arith.constant 0 : i32
    return %c0_i32, %c0_i32_0 : i32, i32
  }
  func.func @transform_5(%arg0: i32) -> (i32, i32) {
    %c0_i32 = arith.constant 0 : i32
    %c0_i32_0 = arith.constant 0 : i32
    %c0_i32_1 = arith.constant 0 : i32
    return %c0_i32, %c0_i32_0 : i32, i32
  }
  func.func @transform_6(%arg0: i32) -> (i32, i32) {
    %c0_i32 = arith.constant 0 : i32
    %c0_i32_0 = arith.constant 0 : i32
    %c0_i32_1 = arith.constant 0 : i32
    return %c0_i32, %c0_i32_0 : i32, i32
  }
  func.func @transform_7(%arg0: i32) -> (i32, i32) {
    %c0_i32 = arith.constant 0 : i32
    %c0_i32_0 = arith.constant 0 : i32
    %c0_i32_1 = arith.constant 0 : i32
    return %c0_i32, %c0_i32_0 : i32, i32
  }
  func.func @transform_8(%arg0: i32) -> (i32, i32) {
    %c0_i32 = arith.constant 0 : i32
    %c0_i32_0 = arith.constant 0 : i32
    %c0_i32_1 = arith.constant 0 : i32
    return %c0_i32, %c0_i32_0 : i32, i32
  }
  func.func @transform_9(%arg0: i32) -> (i32, i32) {
    %c0_i32 = arith.constant 0 : i32
    %c0_i32_0 = arith.constant 0 : i32
    %c0_i32_1 = arith.constant 0 : i32
    return %c0_i32, %c0_i32_0 : i32, i32
  }
  func.func @transform_10(%arg0: i32) -> (i32, i32) {
    %c0_i32 = arith.constant 0 : i32
    %c0_i32_0 = arith.constant 0 : i32
    %c0_i32_1 = arith.constant 0 : i32
    return %c0_i32, %c0_i32_0 : i32, i32
  }
  func.func @transform_11(%arg0: i32) -> (i32, i32) {
    %c0_i32 = arith.constant 0 : i32
    %c0_i32_0 = arith.constant 0 : i32
    %c0_i32_1 = arith.constant 0 : i32
    return %c0_i32, %c0_i32_0 : i32, i32
  }
  func.func @transform_12(%arg0: i32) -> (i32, i32) {
    %c0_i32 = arith.constant 0 : i32
    %c0_i32_0 = arith.constant 0 : i32
    %c0_i32_1 = arith.constant 0 : i32
    return %c0_i32, %c0_i32_0 : i32, i32
  }
  func.func @transform_13(%arg0: i32) -> (i32, i32) {
    %c0_i32 = arith.constant 0 : i32
    %c0_i32_0 = arith.constant 0 : i32
    return %arg0, %c0_i32 : i32, i32
  }
}

</mosaic_0001>

<bundles_post_ra>
// kernel: tpu_custom_call.1
= control target key start
LH: loop header
LB: loop body
LE: loop exit
PB: predicated region body
PF: predicated region fallthrough
CT: control target
= control target key end

     0   :  { %18 = vsyncpa [#allocation3], 0  ;;  %s1963_s0 = inlined_call_operand.hbm [shape: f32[8,32], index: 0, kind: input, shape index: {}]   ;;  %s1964_s1 = inlined_call_operand.vmem [shape: bf16[32,384], index: 1, kind: input, shape index: {}]   ;;  %s1965_s2 = inlined_call_operand.vmem [shape: f32[1,384], index: 2, kind: input, shape index: {}]   ;;  %s1966_s3 = inlined_call_operand.hbm [shape: bf16[384,256], index: 3, kind: input, shape index: {}]   ;;  %s1967_s4 = inlined_call_operand.hbm [shape: f32[1,256], index: 4, kind: input, shape index: {}]   ;;  %s1968_s5 = inlined_call_operand.hbm [shape: bf16[256,128], index: 5, kind: input, shape index: {}]   ;;  %s1969_s6 = inlined_call_operand.vmem [shape: f32[1,128], index: 6, kind: input, shape index: {}]   ;;  %s1970_s7 = inlined_call_operand.vmem [shape: bf16[128,64], index: 7, kind: input, shape index: {}]   ;;  %s1971_s8 = inlined_call_operand.hbm [shape: f32[1,64], index: 8, kind: input, shape index: {}]   ;;  %s1972_s9 = inlined_call_operand.hbm [shape: bf16[64,128], index: 9, kind: input, shape index: {}]   ;;  %s1973_s10 = inlined_call_operand.hbm [shape: f32[1,128], index: 10, kind: input, shape index: {}]   ;;  %s1974_s11 = inlined_call_operand.vmem [shape: bf16[128,128], index: 11, kind: input, shape index: {}]   ;;  %s1975_s12 = inlined_call_operand.vmem [shape: f32[1,128], index: 12, kind: input, shape index: {}]   ;;  %s1976_s13 = inlined_call_operand.hbm [shape: f32[8,128], index: 13, kind: output, shape index: {}]  }
   0x1   :  { %19 = vsyncpa [#allocation6], 0 }
   0x2   :  { %20 = vsyncpa [#allocation9], 0 }
   0x3   :  { %21 = vsyncpa [#allocation12], 0 }
   0x4   :  { %22 = vsyncpa [#allocation4], 0  ;;  %s1731_s25 = smov [#allocation5]  }
   0x5   :  { %s42_s26 = sshll.u32 %s1731_s25, 4  ;;  %s43_s26 = int_to_ptr.vmem [resolvable:$true] %s42_s26 }
   0x6   :  { %s1569_s27 = scalar_lea.vmem %s43_s26, 6144  ;;  %p1574_p1 = scmp.lt.s32.totalorder %s43_s26, %s43_s26 }
   0x7   :  { %p1570_p0 = scmp.ne.s32.totalorder %s43_s26, %s1569_s27  ;;  %p1575_p2 = scmp.lt.s32.totalorder %s1569_s27, %s1569_s27 }
   0x9   :  { %p1576_p3 = por %p1575_p2, %p1574_p1 }
   0xb   :  { %p1577_p4 = pnand %p1576_p3, %p1570_p0 }
   0xd   :  { %1580 = shalt.err (!%p1577_p4)
}
   0xe   :  { %s1732_s28 = smov 128   ;;  %s1733_s29 = smov 8  }
   0xf   :  { %48 = dma.hbm_to_vmem [thread:$0]  %s1966_s3, 6144, %s43_s26, [#allocation6], %s1732_s28, %s1732_s28, %s1733_s29  }
  0x10   :  { %s1734_s15 = smov [#allocation8]  }
  0x11   :  { %s64_s16 = sshll.u32 %s1734_s15, 4  ;;  %s65_s16 = int_to_ptr.vmem [resolvable:$true] %s64_s16 }
  0x12   :  { %s1589_s17 = scalar_lea.vmem %s65_s16, 2048  ;;  %p1594_p6 = scmp.lt.s32.totalorder %s65_s16, %s65_s16 }
  0x13   :  { %p1590_p5 = scmp.ne.s32.totalorder %s65_s16, %s1589_s17  ;;  %p1595_p7 = scmp.lt.s32.totalorder %s1589_s17, %s1589_s17 }
  0x15   :  { %p1596_p8 = por %p1595_p7, %p1594_p6 }
  0x17   :  { %p1597_p9 = pnand %p1596_p8, %p1590_p5 }
  0x19   :  { %1600 = shalt.err (!%p1597_p9)
}
  0x1a   :  { %s1735_s18 = smov 64   ;;  %s1736_s19 = smov 4  }
  0x1b   :  { %70 = dma.hbm_to_vmem [thread:$0]  %s1968_s5, 2048, %s65_s16, [#allocation9], %s1735_s18, %s1735_s18, %s1736_s19  }
  0x1c   :  { %s1737_s22 = smov [#allocation11]   ;;  %s1738_s24 = smov [#allocation2]  }
  0x1d   :  { %s90_s23 = sshll.u32 %s1737_s22, 4  ;;  %s29_s3 = sshll.u32 %s1738_s24, 4  ;;  %s91_s23 = int_to_ptr.vmem [resolvable:$true] %s90_s23  ;;  %s30_s3 = int_to_ptr.vmem [resolvable:$true] %s29_s3 }
  0x1e   :  { %s1609_s25 = scalar_lea.vmem %s91_s23, 512  ;;  %p1614_p11 = scmp.lt.s32.totalorder %s91_s23, %s91_s23 }
  0x1f   :  { %p1610_p10 = scmp.ne.s32.totalorder %s91_s23, %s1609_s25  ;;  %p1615_p12 = scmp.lt.s32.totalorder %s1609_s25, %s1609_s25 }
  0x21   :  { %p1616_p13 = por %p1615_p12, %p1614_p11 }
  0x23   :  { %p1617_p0 = pnand %p1616_p13, %p1610_p10 }
  0x25   :  { %1620 = shalt.err (!%p1617_p0)
}
  0x26   :  { %96 = dma.hbm_to_vmem [thread:$0]  %s1972_s9, 512, %s91_s23, [#allocation12], %s1735_s18, %s1735_s18, %s1736_s19  }
  0x27   :  { %s1629_s28 = scalar_lea.vmem %s30_s3, 128  ;;  %p1634_p2 = scmp.lt.s32.totalorder %s30_s3, %s30_s3 }
  0x28   :  { %p1630_p1 = scmp.ne.s32.totalorder %s30_s3, %s1629_s28  ;;  %p1635_p3 = scmp.lt.s32.totalorder %s1629_s28, %s1629_s28 }
  0x2a   :  { %p1636_p4 = por %p1635_p3, %p1634_p2 }
  0x2c   :  { %p1637_p5 = pnand %p1636_p4, %p1630_p1 }
  0x2e   :  { %1640 = shalt.err (!%p1637_p5)
}
  0x2f   :  { %32 = dma.hbm_to_vmem [thread:$0]  %s1963_s0, 128, %s30_s3, [#allocation3]  }
  0x30   :  { %s1739_s30 = smov [#allocation7]   ;;  %s1740_s15 = smov [#allocation10]  }
  0x31   :  { %s55_s14 = sshll.u32 %s1739_s30, 4  ;;  %s81_s16 = sshll.u32 %s1740_s15, 4  ;;  %s56_s14 = int_to_ptr.vmem [resolvable:$true] %s55_s14  ;;  %s82_s16 = int_to_ptr.vmem [resolvable:$true] %s81_s16 }
  0x32   :  { %s1649_s17 = scalar_lea.vmem %s56_s14, 32  ;;  %p1654_p7 = scmp.lt.s32.totalorder %s56_s14, %s56_s14 }
  0x33   :  { %p1650_p6 = scmp.ne.s32.totalorder %s56_s14, %s1649_s17  ;;  %p1655_p8 = scmp.lt.s32.totalorder %s1649_s17, %s1649_s17 }
  0x35   :  { %p1656_p9 = por %p1655_p8, %p1654_p7 }
  0x37   :  { %p1657_p10 = pnand %p1656_p9, %p1650_p6 }
  0x39   :  { %1660 = shalt.err (!%p1657_p10)
}
  0x3a   :  { %58 = dma.hbm_to_vmem [thread:$0]  %s1967_s4, 32, %s56_s14, [#allocation6]  }
  0x3b   :  { %s1669_s19 = scalar_lea.vmem %s82_s16, 16  ;;  %s1673_s0 = scalar_lea.vmem %s82_s16, 32 }
  0x3c   :  { %p1670_p11 = scmp.ne.s32.totalorder %s82_s16, %s1669_s19  ;;  %p1674_p12 = scmp.lt.s32.totalorder %s82_s16, %s82_s16 }
  0x3d   :  { %p1675_p13 = scmp.lt.s32.totalorder %s1673_s0, %s1669_s19 }
  0x3f   :  { %p1676_p0 = por %p1675_p13, %p1674_p12 }
  0x41   :  { %p1677_p1 = pnand %p1676_p0, %p1670_p11 }
  0x43   :  { %1680 = shalt.err (!%p1677_p1)
}
  0x44   :  { %84 = dma.hbm_to_vmem [thread:$0]  %s1971_s8, 16, %s82_s16, [#allocation9]  }
  0x45   :  { %s1741_s22 = smov [#allocation13]  }
  0x46   :  { %s103_s23 = sshll.u32 %s1741_s22, 4  ;;  %s104_s23 = int_to_ptr.vmem [resolvable:$true] %s103_s23 }
  0x47   :  { %s1689_s24 = scalar_lea.vmem %s104_s23, 16  ;;  %s1693_s3 = scalar_lea.vmem %s104_s23, 32 }
  0x48   :  { %p1690_p2 = scmp.ne.s32.totalorder %s104_s23, %s1689_s24  ;;  %p1694_p3 = scmp.lt.s32.totalorder %s104_s23, %s104_s23 }
  0x49   :  { %p1695_p4 = scmp.lt.s32.totalorder %s1693_s3, %s1689_s24 }
  0x4b   :  { %p1696_p5 = por %p1695_p4, %p1694_p3 }
  0x4d   :  { %p1697_p6 = pnand %p1696_p5, %p1690_p2 }
  0x4f   :  { %1700 = shalt.err (!%p1697_p6)
}
  0x50   :  { %106 = dma.hbm_to_vmem [thread:$0]  %s1973_s10, 16, %s104_s23, [#allocation12]  }
  0x51   :  { %1721 = dma.done.wait [#allocation3], 128  }
  0x52   :  { %1722 = vsyncadd [#allocation3], 4294967168 }
  0x53   :  { %1723 = dma.done.wait [#allocation6], 6176  }
  0x54   :  { %1724 = vsyncadd [#allocation6], 4294961120 }
  0x55   :  { %1725 = dma.done.wait [#allocation9], 2064  }
  0x56   :  { %1726 = vsyncadd [#allocation9], 4294965232 }
  0x57   :  { %1727 = dma.done.wait [#allocation12], 528  }
  0x58   :  { %1728 = vsyncadd [#allocation12], 4294966768  ;;  %v133_v0 = vld [vmem:[#allocation2] sm:$0xff]  ;;  %vm135_vm0 = vcmask 261120   ;;  %v1433_v3 = vld [vmem:[%s1964_s1 + $0x1c] ss:$12 sps:$4 sm:$0xff]   ;;  %v153_v44 = vlaneseq }
  0x59   :  { %v134_v1 = vmul.f32 %v133_v0, %v133_v0  ;;  %v1435_v4 = vld [vmem:[%s1964_s1 + $0x18] ss:$12 sps:$4 sm:$0xff]   ;;  %v1438_v6 = vld [vmem:[%s1964_s1] ss:$12 sps:$4 sm:$0xff]   ;;  %215 = vmatprep.subr.bf16.mxu0 %v1433_v3  ;;  %v1742_v7 = vmov 0   ;;  %v1743_v8 = vmov 0.0  }
  0x5a   :  { %v1436_v5 = vld [vmem:[%s1964_s1 + $0x4] ss:$12 sps:$4 sm:$0xff]   ;;  %235 = vmatprep.mubr.bf16.mxu0 %v1742_v7  ;;  %216 = vmatpush1.bf16.msra.mxu0 %v1435_v4  ;;  %v1439_v13 = vld [vmem:[%s1964_s1 + $0x20] ss:$12 sps:$4 sm:$0xff]   ;;  %v1440_v15 = vld [vmem:[%s1964_s1 + $0x8] ss:$12 sps:$4 sm:$0xff]  }
  0x5b   :  { %v136_v2 = vsel %vm135_vm0, %v134_v1, 0.0  ;;  %672 = vmatprep.mubr.bf16.mxu1 %v1742_v7  ;;  %217 = vmatprep.subr.bf16.mxu0 %v1436_v5  ;;  %vm1744_vm1 = vmmov 0   ;;  %v1441_v16 = vld [vmem:[#allocation5 + $0x70] ss:$8 sps:$4 sm:$0xff]   ;;  %v1443_v17 = vld [vmem:[#allocation5 + $0x74] ss:$8 sps:$4 sm:$0xff]  }
  0x5c   :  { %137 = vadd.xlane.f32.xlu0 %v136_v2  ;;  %v1446_v18 = vld [vmem:[#allocation5 + $0x64] ss:$8 sps:$4 sm:$0xff]   ;;  %v1444_v19 = vld [vmem:[#allocation5 + $0x60] ss:$8 sps:$4 sm:$0xff]   ;;  %v1449_v20 = vld [vmem:[#allocation5 + $0x54] ss:$8 sps:$4 sm:$0xff]  }
  0x5d   :  { %v1465_v21 = vld [vmem:[#allocation5 + $0x174] ss:$8 sps:$4 sm:$0xff]   ;;  %v1470_v22 = vld [vmem:[#allocation5 + $0x170] ss:$8 sps:$4 sm:$0xff]   ;;  %v1471_v23 = vld [vmem:[#allocation5 + $0x164] ss:$8 sps:$4 sm:$0xff]  }
  0x5e   :  { %218 = vmatpush1.bf16.msra.mxu0 %v1438_v6  ;;  %v1447_v24 = vld [vmem:[#allocation5 + $0x50] ss:$8 sps:$4 sm:$0xff]   ;;  %640 = vmatprep.subr.bf16.mxu1 %v1465_v21  ;;  %v1452_v25 = vld [vmem:[#allocation5 + $0x44] ss:$8 sps:$4 sm:$0xff]   ;;  %v1476_v26 = vld [vmem:[#allocation5 + $0x160] ss:$8 sps:$4 sm:$0xff]  }
  0x5f   :  { %1358 = vmatprep.subr.bf16.mxu0 %v1743_v8  ;;  %641 = vmatpush1.bf16.msra.mxu1 %v1470_v22  ;;  %v1477_v27 = vld [vmem:[#allocation5 + $0x154] ss:$8 sps:$4 sm:$0xff]   ;;  %v1450_v28 = vld [vmem:[#allocation5 + $0x40] ss:$8 sps:$4 sm:$0xff]   ;;  %v1482_v30 = vld [vmem:[#allocation5 + $0x150] ss:$8 sps:$4 sm:$0xff]  }
  0x60   :  { %642 = vmatprep.subr.bf16.mxu1 %v1471_v23  ;;  %v1455_v29 = vld [vmem:[#allocation5 + $0x34] ss:$8 sps:$4 sm:$0xff]   ;;  %v1453_v31 = vld [vmem:[#allocation5 + $0x30] ss:$8 sps:$4 sm:$0xff]   ;;  %v1458_v32 = vld [vmem:[#allocation5 + $0x24] ss:$8 sps:$4 sm:$0xff]  }
  0x61   :  { %v1456_v33 = vld [vmem:[#allocation5 + $0x20] ss:$8 sps:$4 sm:$0xff]   ;;  %v1461_v34 = vld [vmem:[#allocation5 + $0x14] ss:$8 sps:$4 sm:$0xff]   ;;  %v1459_v35 = vld [vmem:[#allocation5 + $0x10] ss:$8 sps:$4 sm:$0xff]  }
  0x62   :  { %v1464_v36 = vld [vmem:[#allocation5 + $0x4] ss:$8 sps:$4 sm:$0xff]   ;;  %v1462_v37 = vld [vmem:[#allocation5] ss:$8 sps:$4 sm:$0xff]   ;;  %v1469_v38 = vld [vmem:[#allocation5 + $0xf4] ss:$8 sps:$4 sm:$0xff]  }
  0x63   :  { %643 = vmatpush1.bf16.msra.mxu1 %v1476_v26  ;;  %v1467_v39 = vld [vmem:[#allocation5 + $0xf0] ss:$8 sps:$4 sm:$0xff]   ;;  %v1475_v40 = vld [vmem:[#allocation5 + $0xe4] ss:$8 sps:$4 sm:$0xff]   ;;  %v1473_v41 = vld [vmem:[#allocation5 + $0xe0] ss:$8 sps:$4 sm:$0xff]  }
  0x64   :  { %644 = vmatprep.subr.bf16.mxu1 %v1477_v27  ;;  %v1481_v42 = vld [vmem:[#allocation5 + $0xd4] ss:$8 sps:$4 sm:$0xff]   ;;  %v1479_v43 = vld [vmem:[#allocation5 + $0xd0] ss:$8 sps:$4 sm:$0xff]   ;;  %v1862_v45 = vshrl.u32 %v153_v44, 7  ;;  %vm986_vm2 = vcmask 523264  }
  0x65   :  { %v151_v48 = vld [vmem:[%s1965_s2] sm:$0x7]  ;;  %v1483_v5 = vld [vmem:[#allocation5 + $0x144] ss:$8 sps:$4 sm:$0xff]   ;;  %v1488_v7 = vld [vmem:[#allocation5 + $0x140] ss:$8 sps:$4 sm:$0xff]  }
  0x66   :  { %v159_v46 = vsub.s32 1, %v1862_v45  ;;  %v155_v47 = vsub.s32 0, %v1862_v45  ;;  %v163_v52 = vsub.s32 2, %v1862_v45  ;;  %v1487_v6 = vld [vmem:[#allocation5 + $0xc4] ss:$8 sps:$4 sm:$0xff]   ;;  %v1521_v45 = vld [vmem:[#allocation8 + $0x58] sm:$0xff]  }
  0x67   :  { %645 = vmatpush1.bf16.msra.mxu1 %v1482_v30  ;;  %v1503_v21 = vld [vmem:[#allocation5 + $0x90] ss:$8 sps:$4 sm:$0xff]   ;;  %v1507_v22 = vld [vmem:[#allocation5 + $0x104] ss:$8 sps:$4 sm:$0xff]   ;;  %s1745_s24 = smov [#allocation14]  }
  0x68   :  { %v160_v49 = vrot.slane %v151_v48, %v159_v46  ;;  %v156_v51 = vrot.slane %v151_v48, %v155_v47  ;;  %v164_v57 = vrot.slane %v151_v48, %v163_v52  ;;  %646 = vmatprep.subr.bf16.mxu1 %v1483_v5  ;;  %v1511_v23 = vld [vmem:[#allocation5 + $0x84] ss:$8 sps:$4 sm:$0xff]   ;;  %s1201_s3 = sshll.u32 %s1745_s24, 4  ;;  %s1202_s3 = int_to_ptr.vmem [resolvable:$true] %s1201_s3 }
  0x69   :  { %p1706_p8 = scmp.lt.s32.totalorder %s1202_s3, %s1202_s3 }
  0x6b   :  { %647 = vmatpush1.bf16.msra.mxu1 %v1488_v7 }
  0xe5   :  { %v138_v9 = vpop.xlane.xlu0 %137 }
  0xe6   :  { %v139_v10 = vmax.f32 %v138_v9, 1e-24  ;;  %v1485_v9 = vld [vmem:[#allocation5 + $0xc0] ss:$8 sps:$4 sm:$0xff]  }
  0xe8   :  { %1549 = vrsqrt.f32 %v139_v10  ;;  %v1489_v10 = vld [vmem:[#allocation5 + $0x134] ss:$8 sps:$4 sm:$0xff]  }
  0xe9   :  { %648 = vmatprep.subr.bf16.mxu1 %v1489_v10 }
  0xf5   :  { %v1550_v11 = vpop.eup %1549 }
  0xf6   :  { %v141_v12 = vmul.f32 %v1550_v11, %v133_v0  ;;  %v1491_v11 = vld [vmem:[#allocation5 + $0xb0] ss:$8 sps:$4 sm:$0xff]  }
  0xf8   :  { %v142_v14 = vpack.c.bf16 %v141_v12, %v141_v12  ;;  %v1493_v12 = vld [vmem:[#allocation5 + $0xb4] ss:$8 sps:$4 sm:$0xff]  }
  0xfa   :  { %1219 = vmatmul.mubr.msk.bf16.vlgmr.msra.gmra.mxu0 %vm135_vm0, %v142_v14 }
  0xfb   :  { %1359 = vmatpush3.bf16.msra.mxu0 %v1439_v13  ;;  %1362 = vmatprep.mubr.msk.bf16.mxu0 %vm1744_vm1, %v1743_v8  ;;  %v1494_v13 = vld [vmem:[#allocation5 + $0x130] ss:$8 sps:$4 sm:$0xff]  }
  0xfc   :  { %1360 = vmatprep.subr.bf16.mxu0 %v1743_v8  ;;  %649 = vmatpush1.bf16.msra.mxu1 %v1494_v13  ;;  %v1529_v13 = vld [vmem:[%s1970_s7 + $0x38] sm:$0xff]  }
  0xff   :  { %1361 = vmatpush3.bf16.msra.mxu0 %v1440_v15  ;;  %v1499_v15 = vld [vmem:[#allocation5 + $0xa4] ss:$8 sps:$4 sm:$0xff]  }
 0x100   :  { %599 = vmatprep.subr.bf16.mxu0 %v1443_v17  ;;  %v1497_v17 = vld [vmem:[#allocation5 + $0xa0] ss:$8 sps:$4 sm:$0xff]  }
 0x102   :  { %1363 = vmatmul.mubr.msk.bf16.vlgmr.msra.gmra.mxu0 %vm135_vm0, %v142_v14  ;;  %v1495_v14 = vld [vmem:[#allocation5 + $0x124] ss:$8 sps:$4 sm:$0xff]  }
 0x103   :  { %600 = vmatpush1.bf16.msra.mxu0 %v1441_v16  ;;  %v1500_v16 = vld [vmem:[#allocation5 + $0x120] ss:$8 sps:$4 sm:$0xff]   ;;  %650 = vmatprep.subr.bf16.mxu1 %v1495_v14 }
 0x104   :  { %601 = vmatprep.subr.bf16.mxu0 %v1446_v18  ;;  %v1501_v18 = vld [vmem:[#allocation5 + $0x114] ss:$8 sps:$4 sm:$0xff]   ;;  %651 = vmatpush1.bf16.msra.mxu1 %v1500_v16  ;;  %v1530_v14 = vld [vmem:[%s1970_s7 + $0x30] sm:$0xff]  }
 0x105   :  { %652 = vmatprep.subr.bf16.mxu1 %v1501_v18 }
 0x107   :  { %602 = vmatpush1.bf16.msra.mxu0 %v1444_v19  ;;  %v1505_v19 = vld [vmem:[#allocation5 + $0x94] ss:$8 sps:$4 sm:$0xff]  }
 0x108   :  { %603 = vmatprep.subr.bf16.mxu0 %v1449_v20  ;;  %v1506_v20 = vld [vmem:[#allocation5 + $0x110] ss:$8 sps:$4 sm:$0xff]  }
 0x109   :  { %653 = vmatpush1.bf16.msra.mxu1 %v1506_v20 }
 0x10a   :  { %654 = vmatprep.subr.bf16.mxu1 %v1507_v22 }
 0x10b   :  { %604 = vmatpush1.bf16.msra.mxu0 %v1447_v24  ;;  %v1512_v24 = vld [vmem:[#allocation5 + $0x100] ss:$8 sps:$4 sm:$0xff]  }
 0x10c   :  { %605 = vmatprep.subr.bf16.mxu0 %v1452_v25  ;;  %v1509_v25 = vld [vmem:[#allocation5 + $0x80] ss:$8 sps:$4 sm:$0xff]  }
 0x10d   :  { %655 = vmatpush1.bf16.msra.mxu1 %v1512_v24  ;;  %v1532_v24 = vld [vmem:[%s1970_s7 + $0x20] sm:$0xff]  }
 0x10f   :  { %606 = vmatpush1.bf16.msra.mxu0 %v1450_v28 }
 0x110   :  { %607 = vmatprep.subr.bf16.mxu0 %v1455_v29 }
 0x113   :  { %608 = vmatpush1.bf16.msra.mxu0 %v1453_v31 }
 0x114   :  { %609 = vmatprep.subr.bf16.mxu0 %v1458_v32 }
 0x117   :  { %610 = vmatpush1.bf16.msra.mxu0 %v1456_v33 }
 0x118   :  { %611 = vmatprep.subr.bf16.mxu0 %v1461_v34 }
 0x11b   :  { %612 = vmatpush1.bf16.msra.mxu0 %v1459_v35  ;;  %v1513_v35 = vld [vmem:[#allocation8 + $0x78] sm:$0xff]  }
 0x11c   :  { %613 = vmatprep.subr.bf16.mxu0 %v1464_v36  ;;  %v1514_v36 = vld [vmem:[#allocation8 + $0x38] sm:$0xff]   ;;  %1313 = vmatprep.subr.bf16.mxu1 %v1513_v35 }
 0x11f   :  { %614 = vmatpush1.bf16.msra.mxu0 %v1462_v37  ;;  %v1515_v37 = vld [vmem:[#allocation8 + $0x70] sm:$0xff]  }
 0x120   :  { %615 = vmatprep.subr.bf16.mxu0 %v1469_v38  ;;  %v1516_v38 = vld [vmem:[#allocation8 + $0x30] sm:$0xff]  }
 0x123   :  { %616 = vmatpush2.bf16.msra.mxu0 %v1467_v39  ;;  %v1517_v39 = vld [vmem:[#allocation8 + $0x68] sm:$0xff]  }
 0x124   :  { %617 = vmatprep.subr.bf16.mxu0 %v1475_v40  ;;  %v1518_v40 = vld [vmem:[#allocation8 + $0x28] sm:$0xff]  }
 0x127   :  { %618 = vmatpush2.bf16.msra.mxu0 %v1473_v41  ;;  %v347_v41 = vld [vmem:[#allocation7] sm:$0x3] }
 0x128   :  { %619 = vmatprep.subr.bf16.mxu0 %v1481_v42  ;;  %v352_v42 = vrot.slane %v347_v41, %v155_v47  ;;  %v356_v44 = vrot.slane %v347_v41, %v159_v46  ;;  %v1519_v47 = vld [vmem:[#allocation8 + $0x60] sm:$0xff]   ;;  %v1522_v46 = vld [vmem:[#allocation8 + $0x18] sm:$0xff]  }
 0x12b   :  { %620 = vmatpush2.bf16.msra.mxu0 %v1479_v43 }
 0x12c   :  { %621 = vmatprep.subr.bf16.mxu0 %v1487_v6 }
 0x12f   :  { %622 = vmatpush2.bf16.msra.mxu0 %v1485_v9 }
 0x130   :  { %623 = vmatprep.subr.bf16.mxu0 %v1493_v12 }
 0x133   :  { %624 = vmatpush2.bf16.msra.mxu0 %v1491_v11 }
 0x134   :  { %625 = vmatprep.subr.bf16.mxu0 %v1499_v15  ;;  %v1531_v15 = vld [vmem:[%s1970_s7 + $0x28] sm:$0xff]  }
 0x137   :  { %626 = vmatpush2.bf16.msra.mxu0 %v1497_v17  ;;  %v1269_v17 = vld [vmem:[%s1969_s6] ss:$0 sm:$0xff] }
 0x138   :  { %627 = vmatprep.subr.bf16.mxu0 %v1505_v19 }
 0x13b   :  { %628 = vmatpush2.bf16.msra.mxu0 %v1503_v21 }
 0x13c   :  { %629 = vmatprep.subr.bf16.mxu0 %v1511_v23 }
 0x13f   :  { %630 = vmatpush2.bf16.msra.mxu0 %v1509_v25  ;;  %v1533_v25 = vld [vmem:[%s1970_s7 + $0x18] sm:$0xff]  }
 0x140   :  { %1366 = vmatprep.subr.bf16.mxu0 %v1743_v8 }
 0x1ba   :  { %v237_v50 = vpop.f32.mrf.mxu0 }
 0x1bb   :  { %v238_v56 = vadd.f32 %v237_v50, %v156_v51 }
 0x1bc   :  { %v239_v53 = vpop.f32.mrf.mxu0 }
 0x1bd   :  { %v240_v54 = vadd.f32 %v239_v53, %v160_v49  ;;  %v284_v61 = vmul.f32 %v238_v56, %v238_v56 }
 0x1be   :  { %v241_v55 = vpop.f32.mrf.mxu0 }
 0x1bf   :  { %v285_v59 = vmul.f32 %v240_v54, %v240_v54 }
 0x1c0   :  { %v242_v58 = vpop.f32.mrf.mxu0 }
 0x1c1   :  { %v287_v1 = vadd.f32 %v285_v59, %v284_v61 }
 0x1c2   :  { %v278_v60 = vpop.f32.mrf.mxu0 }
 0x1c3   :  { %v279_v62 = vadd.f32 %v278_v60, %v164_v57 }
 0x1c4   :  { %v1364_v63 = vpop.f32.mrf.mxu0 }
 0x1c5   :  { %v286_v0 = vmul.f32 %v279_v62, %v279_v62  ;;  %v1523_v63 = vld [vmem:[#allocation8 + $0x50] sm:$0xff]  }
 0x1c6   :  { %v281_v2 = vpop.f32.mrf.mxu0 }
 0x1c7   :  { %v288_v3 = vadd.f32 %v287_v1, %v286_v0  ;;  %v1524_v0 = vld [vmem:[#allocation8 + $0x10] sm:$0xff]   ;;  %v1525_v1 = vld [vmem:[#allocation8 + $0x48] sm:$0xff]  }
 0x1c8   :  { %v1365_v4 = vpop.f32.mrf.mxu0  ;;  %v1526_v2 = vld [vmem:[#allocation8 + $0x8] sm:$0xff]  }
 0x1c9   :  { %289 = vadd.xlane.f32.xlu0 %v288_v3  ;;  %v1527_v3 = vld [vmem:[#allocation8 + $0x40] sm:$0xff]  }
 0x1ca   :  { %v1528_v4 = vld [vmem:[#allocation8] sm:$0xff]  }
 0x252   :  { %v290_v26 = vpop.xlane.xlu0 %289 }
 0x253   :  { %v291_v27 = vmax.f32 %v290_v26, 1e-24  ;;  %v1534_v26 = vld [vmem:[%s1970_s7 + $0x10] sm:$0xff]  }
 0x255   :  { %1551 = vrsqrt.f32 %v291_v27  ;;  %v1535_v27 = vld [vmem:[%s1970_s7 + $0x8] sm:$0xff]  }
 0x262   :  { %v1552_v28 = vpop.eup %1551 }
 0x263   :  { %v294_v29 = vmul.f32 %v1552_v28, %v240_v54  ;;  %v295_v30 = vmul.f32 %v1552_v28, %v279_v62  ;;  %v293_v31 = vmul.f32 %v1552_v28, %v238_v56  ;;  %v1520_v62 = vld [vmem:[#allocation8 + $0x20] sm:$0xff]   ;;  %v1536_v28 = vld [vmem:[%s1970_s7] sm:$0xff]  }
 0x265   :  { %v297_v32 = vpack.c.bf16 %v294_v29, %v294_v29  ;;  %v298_v33 = vpack.c.bf16 %v295_v30, %v295_v30  ;;  %v296_v34 = vpack.c.bf16 %v293_v31, %v293_v31 }
 0x267   :  { %631 = vmatprep.mubr.bf16.mxu0 %v297_v32  ;;  %673 = vmatmul.mubr.bf16.vlgmr.msra.gmra.mxu1 %v298_v33 }
 0x268   :  { %632 = vmatmul.mubr.bf16.vlgmr.msra.gmra.mxu0 %v296_v34  ;;  %1314 = vmatpush3.bf16.msra.mxu1 %v1514_v36  ;;  %v1286_v34 = vld [vmem:[#allocation10] ss:$0 sm:$0xff] }
 0x269   :  { %1382 = vmatprep.mubr.msk.bf16.mxu0 %vm1744_vm1, %v1743_v8  ;;  %1315 = vmatprep.subr.bf16.mxu1 %v1515_v37 }
 0x26a   :  { %1367 = vmatpush3.bf16.msra.mxu0 %v1529_v13 }
 0x26b   :  { %1368 = vmatprep.subr.bf16.mxu0 %v1743_v8 }
 0x26c   :  { %1316 = vmatpush3.bf16.msra.mxu1 %v1516_v38 }
 0x26d   :  { %1317 = vmatprep.subr.bf16.mxu1 %v1517_v39 }
 0x26e   :  { %1369 = vmatpush3.bf16.msra.mxu0 %v1530_v14 }
 0x26f   :  { %1370 = vmatprep.subr.bf16.mxu0 %v1743_v8 }
 0x270   :  { %1318 = vmatpush3.bf16.msra.mxu1 %v1518_v40 }
 0x271   :  { %1319 = vmatprep.subr.bf16.mxu1 %v1519_v47 }
 0x272   :  { %1371 = vmatpush3.bf16.msra.mxu0 %v1531_v15 }
 0x273   :  { %1372 = vmatprep.subr.bf16.mxu0 %v1743_v8 }
 0x274   :  { %1320 = vmatpush3.bf16.msra.mxu1 %v1520_v62 }
 0x275   :  { %1321 = vmatprep.subr.bf16.mxu1 %v1521_v45  ;;  %v1544_v45 = vld [vmem:[%s1974_s11 + $0x20] sm:$0xff]  }
 0x276   :  { %1373 = vmatpush3.bf16.msra.mxu0 %v1532_v24 }
 0x277   :  { %1374 = vmatprep.subr.bf16.mxu0 %v1743_v8 }
 0x278   :  { %1322 = vmatpush3.bf16.msra.mxu1 %v1522_v46  ;;  %v1545_v46 = vld [vmem:[%s1974_s11 + $0x18] sm:$0xff]  }
 0x279   :  { %1323 = vmatprep.subr.bf16.mxu1 %v1523_v63  ;;  %v1546_v63 = vld [vmem:[%s1974_s11 + $0x10] sm:$0xff]  }
 0x27a   :  { %1375 = vmatpush3.bf16.msra.mxu0 %v1533_v25 }
 0x27b   :  { %1376 = vmatprep.subr.bf16.mxu0 %v1743_v8 }
 0x27c   :  { %1324 = vmatpush3.bf16.msra.mxu1 %v1524_v0  ;;  %v1547_v0 = vld [vmem:[%s1974_s11 + $0x8] sm:$0xff]  }
 0x27d   :  { %1325 = vmatprep.subr.bf16.mxu1 %v1525_v1  ;;  %v1548_v1 = vld [vmem:[%s1974_s11] sm:$0xff]  }
 0x27e   :  { %1377 = vmatpush3.bf16.msra.mxu0 %v1534_v26 }
 0x27f   :  { %1378 = vmatprep.subr.bf16.mxu0 %v1743_v8 }
 0x280   :  { %1326 = vmatpush3.bf16.msra.mxu1 %v1526_v2 }
 0x281   :  { %1327 = vmatprep.subr.bf16.mxu1 %v1527_v3 }
 0x282   :  { %1379 = vmatpush3.bf16.msra.mxu0 %v1535_v27 }
 0x283   :  { %1380 = vmatprep.subr.bf16.mxu0 %v1743_v8 }
 0x284   :  { %1328 = vmatpush3.bf16.msra.mxu1 %v1528_v4 }
 0x285   :  { %1386 = vmatprep.subr.bf16.mxu1 %v1743_v8 }
 0x286   :  { %1381 = vmatpush3.bf16.msra.mxu0 %v1536_v28 }
 0x327   :  { %v674_v43 = vpop.f32.mrf.mxu1 }
 0x328   :  { %v633_v48 = vpop.f32.mrf.mxu0 }
 0x329   :  { %v634_v49 = vadd.f32 %v633_v48, %v352_v42  ;;  %v676_v50 = vpop.f32.mrf.mxu1  ;;  %v1537_v42 = vld [vmem:[#allocation11 + $0x18] sm:$0xff]   ;;  %v1540_v48 = vld [vmem:[#allocation11] sm:$0xff]  }
 0x32a   :  { %v635_v51 = vpop.f32.mrf.mxu0 }
 0x32b   :  { %v675_v52 = vadd.f32 %v674_v43, %v634_v49  ;;  %v636_v53 = vadd.f32 %v635_v51, %v356_v44  ;;  %v678_v54 = vpop.f32.mrf.mxu1  ;;  %v1538_v43 = vld [vmem:[#allocation11 + $0x10] sm:$0xff]   ;;  %v1539_v44 = vld [vmem:[#allocation11 + $0x8] sm:$0xff]  }
 0x32c   :  { %v637_v55 = vpop.f32.mrf.mxu0  ;;  %v1541_v54 = vld [vmem:[%s1974_s11 + $0x38] sm:$0xff]  }
 0x32d   :  { %v677_v56 = vadd.f32 %v676_v50, %v636_v53  ;;  %v679_v57 = vpop.f32.mrf.mxu1  ;;  %v681_v59 = vmul.f32 %v675_v52, %v675_v52  ;;  %v1542_v55 = vld [vmem:[%s1974_s11 + $0x30] sm:$0xff]  }
 0x32e   :  { %v638_v58 = vpop.f32.mrf.mxu0  ;;  %v1295_v57 = vld [vmem:[#allocation13] ss:$0 sm:$0xff] }
 0x32f   :  { %v682_v60 = vmul.f32 %v677_v56, %v677_v56 }
 0x331   :  { %v683_v61 = vadd.f32 %v682_v60, %v681_v59 }
 0x333   :  { %684 = vadd.xlane.f32.xlu1 %v683_v61 }
 0x3bc   :  { %v685_v5 = vpop.xlane.xlu1 %684 }
 0x3bd   :  { %v686_v6 = vmax.f32 %v685_v5, 1e-24 }
 0x3bf   :  { %1553 = vrsqrt.f32 %v686_v6 }
 0x3cc   :  { %v1554_v7 = vpop.eup %1553 }
 0x3cd   :  { %v689_v9 = vmul.f32 %v1554_v7, %v677_v56  ;;  %v688_v10 = vmul.f32 %v1554_v7, %v675_v52  ;;  %v1543_v56 = vld [vmem:[%s1974_s11 + $0x28] sm:$0xff]   ;;  %v1301_v7 = vld [vmem:[%s1975_s12] ss:$0 sm:$0xff]  ;;  %s1701_s11 = scalar_lea.vmem %s1202_s3, 128 }
 0x3ce   :  { %p1702_p7 = scmp.ne.s32.totalorder %s1202_s3, %s1701_s11  ;;  %p1707_p9 = scmp.lt.s32.totalorder %s1701_s11, %s1701_s11 }
 0x3cf   :  { %v691_v11 = vpack.c.bf16 %v689_v9, %v689_v9  ;;  %v690_v12 = vpack.c.bf16 %v688_v10, %v688_v10 }
 0x3d0   :  { %p1708_p10 = por %p1707_p9, %p1706_p8 }
 0x3d1   :  { %859 = vmatprep.mubr.bf16.mxu1 %v691_v11 }
 0x3d2   :  { %860 = vmatmul.mubr.bf16.vlgmr.msra.gmra.mxu1 %v690_v12  ;;  %p1709_p11 = pnand %p1708_p10, %p1702_p7 }
 0x3d3   :  { %1394 = vmatprep.mubr.msk.bf16.mxu1 %vm1744_vm1, %v1743_v8  ;;  %1387 = vmatpush3.bf16.msra.mxu1 %v1537_v42 }
 0x3d4   :  { %1388 = vmatprep.subr.bf16.mxu1 %v1743_v8 }
 0x3d7   :  { %1389 = vmatpush3.bf16.msra.mxu1 %v1538_v43 }
 0x3d8   :  { %1390 = vmatprep.subr.bf16.mxu1 %v1743_v8 }
 0x3db   :  { %1391 = vmatpush3.bf16.msra.mxu1 %v1539_v44 }
 0x3dc   :  { %1392 = vmatprep.subr.bf16.mxu1 %v1743_v8 }
 0x3df   :  { %1393 = vmatpush3.bf16.msra.mxu1 %v1540_v48 }
 0x3e0   :  { %1398 = vmatprep.subr.bf16.mxu1 %v1743_v8 }
 0x492   :  { %v1329_v16 = vpop.f32.mrf.mxu1 }
 0x494   :  { %v1330_v18 = vpop.f32.mrf.mxu1 }
 0x495   :  { %v1331_v19 = vadd.f32 %v1330_v18, %v1329_v16 }
 0x496   :  { %v1332_v20 = vpop.f32.mrf.mxu1 }
 0x497   :  { %v862_v21 = vadd.f32 %v1331_v19, %v1269_v17 }
 0x498   :  { %v1333_v22 = vpop.f32.mrf.mxu1 }
 0x499   :  { %v867_v23 = vmul.f32 %v862_v21, %v862_v21 }
 0x49b   :  { %868 = vadd.xlane.f32.xlu1 %v867_v23 }
 0x524   :  { %v869_v29 = vpop.xlane.xlu1 %868 }
 0x525   :  { %v870_v30 = vmax.f32 %v869_v29, 1e-24 }
 0x527   :  { %1555 = vrsqrt.f32 %v870_v30 }
 0x534   :  { %v1556_v31 = vpop.eup %1555 }
 0x535   :  { %v872_v32 = vmul.f32 %v1556_v31, %v862_v21 }
 0x537   :  { %v873_v33 = vpack.c.bf16 %v872_v32, %v872_v32 }
 0x539   :  { %1383 = vmatmul.mubr.bf16.vlgmr.msra.gmra.mxu0 %v873_v33 }
 0x5f9   :  { %v979_v35 = vpop.f32.mrf.mxu0 }
 0x5fa   :  { %v980_v36 = vadd.f32 %v1286_v34, %v979_v35 }
 0x5fb   :  { %v1384_v37 = vpop.f32.mrf.mxu0 }
 0x5fc   :  { %v985_v38 = vmul.f32 %v980_v36, %v980_v36 }
 0x5fd   :  { %v982_v39 = vpop.f32.mrf.mxu0 }
 0x5fe   :  { %v987_v40 = vsel %vm986_vm2, %v985_v38, 0.0 }
 0x5ff   :  { %988 = vadd.xlane.f32.xlu0 %v987_v40  ;;  %v1385_v41 = vpop.f32.mrf.mxu0 }
 0x688   :  { %v989_v49 = vpop.xlane.xlu0 %988 }
 0x689   :  { %v990_v50 = vmax.f32 %v989_v49, 1e-24 }
 0x68b   :  { %1557 = vrsqrt.f32 %v990_v50 }
 0x698   :  { %v1558_v51 = vpop.eup %1557 }
 0x699   :  { %v992_v52 = vmul.f32 %v1558_v51, %v980_v36 }
 0x69b   :  { %v993_v53 = vpack.c.bf16 %v992_v52, %v992_v52 }
 0x69d   :  { %1395 = vmatmul.mubr.msk.bf16.vlgmr.msra.gmra.mxu1 %vm986_vm2, %v993_v53 }
 0x69e   :  { %1414 = vmatprep.mubr.msk.bf16.mxu1 %vm1744_vm1, %v1743_v8  ;;  %1399 = vmatpush3.bf16.msra.mxu1 %v1541_v54 }
 0x69f   :  { %1400 = vmatprep.subr.bf16.mxu1 %v1743_v8 }
 0x6a2   :  { %1401 = vmatpush3.bf16.msra.mxu1 %v1542_v55 }
 0x6a3   :  { %1402 = vmatprep.subr.bf16.mxu1 %v1743_v8 }
 0x6a6   :  { %1403 = vmatpush3.bf16.msra.mxu1 %v1543_v56 }
 0x6a7   :  { %1404 = vmatprep.subr.bf16.mxu1 %v1743_v8 }
 0x6aa   :  { %1405 = vmatpush3.bf16.msra.mxu1 %v1544_v45 }
 0x6ab   :  { %1406 = vmatprep.subr.bf16.mxu1 %v1743_v8 }
 0x6ae   :  { %1407 = vmatpush3.bf16.msra.mxu1 %v1545_v46 }
 0x6af   :  { %1408 = vmatprep.subr.bf16.mxu1 %v1743_v8 }
 0x6b2   :  { %1409 = vmatpush3.bf16.msra.mxu1 %v1546_v63 }
 0x6b3   :  { %1410 = vmatprep.subr.bf16.mxu1 %v1743_v8 }
 0x6b6   :  { %1411 = vmatpush3.bf16.msra.mxu1 %v1547_v0 }
 0x6b7   :  { %1412 = vmatprep.subr.bf16.mxu1 %v1743_v8 }
 0x6ba   :  { %1413 = vmatpush3.bf16.msra.mxu1 %v1548_v1 }
 0x75d   :  { %v1070_v58 = vpop.f32.mrf.mxu1 }
 0x75e   :  { %v1071_v59 = vadd.f32 %v1295_v57, %v1070_v58 }
 0x75f   :  { %v1396_v60 = vpop.f32.mrf.mxu1 }
 0x760   :  { %v1076_v61 = vmul.f32 %v1071_v59, %v1071_v59 }
 0x761   :  { %v1073_v47 = vpop.f32.mrf.mxu1 }
 0x762   :  { %1077 = vadd.xlane.f32.xlu1 %v1076_v61 }
 0x763   :  { %v1397_v62 = vpop.f32.mrf.mxu1 }
 0x7eb   :  { %v1078_v2 = vpop.xlane.xlu1 %1077 }
 0x7ec   :  { %v1079_v3 = vmax.f32 %v1078_v2, 1e-24 }
 0x7ee   :  { %1559 = vrsqrt.f32 %v1079_v3 }
 0x7fb   :  { %v1560_v4 = vpop.eup %1559 }
 0x7fc   :  { %v1081_v5 = vmul.f32 %v1560_v4, %v1071_v59 }
 0x7fe   :  { %v1082_v6 = vpack.c.bf16 %v1081_v5, %v1081_v5 }
 0x800   :  { %1415 = vmatmul.mubr.bf16.vlgmr.msra.gmra.mxu1 %v1082_v6 }
 0x8c0   :  { %v1188_v9 = vpop.f32.mrf.mxu1 }
 0x8c1   :  { %v1189_v10 = vadd.f32 %v1301_v7, %v1188_v9 }
 0x8c2   :  { %v1416_v11 = vpop.f32.mrf.mxu1 }
 0x8c3   :  { %1194 = vst [vmem:[#allocation14] sm:$0xff] %v1189_v10 }
 0x8c4   :  { %v1191_v8 = vpop.f32.mrf.mxu1 }
 0x8c5   :  { %1712 = shalt.err (!%p1709_p11)
}
 0x8c6   :  { %1204 = dma.vmem_to_hbm [thread:$0]  %s1202_s3, 128, %s1976_s13, [#allocation4]   ;;  %v1417_v12 = vpop.f32.mrf.mxu1 }
 0x8c7   :  { %1729 = dma.done.wait [#allocation4], 128  }
 0x8c8   :  { %1730 = vsyncadd [#allocation4], 4294967168 }
 0x8c9   :  { %1208 = vsyncpa [#allocation3], 1 }
 0x8ca   :  { %1209 = vsyncpa [#allocation6], 1 }
 0x8cb   :  { %1210 = vsyncpa [#allocation9], 1 }
 0x8cc   :  { %1211 = vsyncpa [#allocation12], 1 }
 0x8cd   :  { %1212 = vsyncpa [#allocation4], 1 }

</bundles_post_ra>
